<compile_context>
chip_gen: v7x
topology: tpu7x:2x2x1
jax: 0.10.0
libtpu: 0.0.40
codegen_flags: <defaults>
</compile_context>

<pallas_src>
import jax
import jax.numpy as jnp
from jax.experimental import pallas as pl
from jax.experimental.pallas import tpu as pltpu

EPS = 1e-5


def _bn4_kernel(x_ref, a_ref, c_ref, o_ref):
    # x_ref / o_ref: (tR, tL) tile of the flattened (N*C, L) array.
    # a_ref / c_ref: (tR, 1) fused per-row scale / offset, broadcast over lanes.
    x = x_ref[...].astype(jnp.float32)
    o_ref[...] = (x * a_ref[...] + c_ref[...]).astype(o_ref.dtype)


def _round_up(v, m):
    return ((v + m - 1) // m) * m


def batchnorm1d_inference_x4(x, running_mean, running_var, weight, bias, *, eps=EPS):
    """Applies inference BatchNorm1d four times. x: (N, C, L)."""
    N, C, L = x.shape
    R = N * C

    # Fold four identical inference BatchNorms into one affine y = a*x + c:
    #   single application: y = s*x + t, s = w / sqrt(var + eps), t = b - mean*s
    #   four applications:  a = s^4,  c = t * (1 + s + s^2 + s^3)
    s = weight.astype(jnp.float32) / jnp.sqrt(running_var.astype(jnp.float32) + eps)
    t = bias.astype(jnp.float32) - running_mean.astype(jnp.float32) * s
    a = (s * s) * (s * s)
    c = t * (1.0 + s + s * s + s * s * s)

    # Per-row fused params for the flattened (N*C, L) view.
    a_row = jnp.broadcast_to(a.reshape(1, C, 1), (N, C, 1)).reshape(R, 1)
    c_row = jnp.broadcast_to(c.reshape(1, C, 1), (N, C, 1)).reshape(R, 1)

    x2d = x.reshape(R, L)

    # Dense, (8,128)-aligned tiles; ~1 MiB f32 per x block at the cap, with
    # masked tail blocks instead of divisor searches.
    tR = min(256, _round_up(R, 8))
    tL = min(1024, _round_up(L, 128))
    grid = (pl.cdiv(R, tR), pl.cdiv(L, tL))

    x_spec = pl.BlockSpec((tR, tL), lambda r, l: (r, l))
    p_spec = pl.BlockSpec((tR, 1), lambda r, l: (r, 0))

    itemsize = jnp.dtype(x.dtype).itemsize
    cost = pl.CostEstimate(
        flops=2 * R * L,
        bytes_accessed=2 * R * L * itemsize,
        transcendentals=0,
    )

    out2d = pl.pallas_call(
        _bn4_kernel,
        out_shape=jax.ShapeDtypeStruct((R, L), x.dtype),
        grid=grid,
        in_specs=[x_spec, p_spec, p_spec],
        out_specs=x_spec,
        compiler_params=pltpu.CompilerParams(
            dimension_semantics=("parallel", "parallel")),
        cost_estimate=cost,
    )(x2d, a_row, c_row)

    return out2d.reshape(N, C, L)


def reference(x, running_mean, running_var, weight, bias, eps=EPS):
    m = running_mean.reshape(1, -1, 1)
    v = running_var.reshape(1, -1, 1)
    w = weight.reshape(1, -1, 1)
    b = bias.reshape(1, -1, 1)
    y = x.astype(jnp.float32)
    for _ in range(4):
        y = (y - m) / jnp.sqrt(v + eps) * w + b
    return y.astype(x.dtype)


if __name__ == "__main__":
    key = jax.random.PRNGKey(0)
    kx, km, kv, kw, kb = jax.random.split(key, 5)

    N, C, L = 2, 3, 8  # BatchNorm1d(3) -> C = 3
    x = jax.random.normal(kx, (N, C, L), dtype=jnp.float32)

    # Deterministic synthetic "running stats" / affine params (shapes per __init__).
    running_mean = jax.random.normal(km, (C,), dtype=jnp.float32) * 0.1
    running_var = jax.random.uniform(kv, (C,), dtype=jnp.float32, minval=0.5, maxval=1.5)
    weight = jax.random.normal(kw, (C,), dtype=jnp.float32) * 0.1 + 1.0
    bias = jax.random.normal(kb, (C,), dtype=jnp.float32) * 0.1

    y = batchnorm1d_inference_x4(x, running_mean, running_var, weight, bias)
    jax.block_until_ready(y)
    y_ref = reference(x, running_mean, running_var, weight, bias)
    assert y.shape == x.shape and y.dtype == x.dtype
    assert jnp.allclose(y, y_ref, atol=1e-5, rtol=1e-5), "mismatch vs reference (small)"

    # Exercise the multi-block path: non-multiple-of-128 L (masked tail) and
    # more than one row block.
    N2, L2 = 40, 1500   # R = 120 rows, grid = (1, 2) with a masked lane tail
    x2 = jax.random.normal(kx, (N2, C, L2), dtype=jnp.float32)
    y2 = batchnorm1d_inference_x4(x2, running_mean, running_var, weight, bias)
    jax.block_until_ready(y2)
    y2_ref = reference(x2, running_mean, running_var, weight, bias)
    assert jnp.allclose(y2, y2_ref, atol=1e-5, rtol=1e-5), "mismatch vs reference (tiled)"

    print("KERNEL_OK")
</pallas_src>

<mosaic_0001>
module attributes {stable_mosaic.version = 11 : i64} {
  func.func @_bn4_kernel(%arg0: i32, %arg1: i32, %arg2: memref<8x128xf32, #tpu.memory_space<vmem>>, %arg3: memref<8x1xf32, #tpu.memory_space<vmem>>, %arg4: memref<8x1xf32, #tpu.memory_space<vmem>>, %arg5: memref<8x128xf32, #tpu.memory_space<vmem>>) attributes {dimension_semantics = [#tpu.dimension_semantics<parallel>, #tpu.dimension_semantics<parallel>], iteration_bounds = array<i64: 1, 1>, scalar_prefetch = 0 : i64, scratch_operands = 0 : i64, tpu.core_type = #tpu.core_type<tc>, window_params = [{transform_indices = @transform_0, window_bounds = array<i64: 8, 128>}, {transform_indices = @transform_1, window_bounds = array<i64: 8, 1>}, {transform_indices = @transform_2, window_bounds = array<i64: 8, 1>}, {transform_indices = @transform_3, window_bounds = array<i64: 8, 128>}]} {
    %c0 = arith.constant 0 : index
    %c0_0 = arith.constant 0 : index
    %0 = vector.load %arg2[%c0, %c0_0] : memref<8x128xf32, #tpu.memory_space<vmem>>, vector<8x128xf32>
    %c0_1 = arith.constant 0 : index
    %c0_2 = arith.constant 0 : index
    %1 = vector.load %arg3[%c0_1, %c0_2] : memref<8x1xf32, #tpu.memory_space<vmem>>, vector<8x1xf32>
    %2 = vector.broadcast %1 : vector<8x1xf32> to vector<8x128xf32>
    %3 = arith.mulf %0, %2 : vector<8x128xf32>
    %c0_3 = arith.constant 0 : index
    %c0_4 = arith.constant 0 : index
    %4 = vector.load %arg4[%c0_3, %c0_4] : memref<8x1xf32, #tpu.memory_space<vmem>>, vector<8x1xf32>
    %5 = vector.broadcast %4 : vector<8x1xf32> to vector<8x128xf32>
    %6 = arith.addf %3, %5 : vector<8x128xf32>
    %c0_5 = arith.constant 0 : index
    %c0_6 = arith.constant 0 : index
    %7 = vector.load %arg5[%c0_5, %c0_6] : memref<8x128xf32, #tpu.memory_space<vmem>>, vector<8x128xf32>
    tpu.vector_store %arg5[%c0_5, %c0_6], %6 {strides = array<i32>} : memref<8x128xf32, #tpu.memory_space<vmem>>, vector<8x128xf32>,
    return
  }
  func.func @transform_0(%arg0: i32, %arg1: i32) -> (i32, i32) {
    %c0_i32 = arith.constant 0 : i32
    return %arg0, %arg1 : i32, i32
  }
  func.func @transform_1(%arg0: i32, %arg1: i32) -> (i32, i32) {
    %c0_i32 = arith.constant 0 : i32
    %c0_i32_0 = arith.constant 0 : i32
    return %arg0, %c0_i32 : i32, i32
  }
  func.func @transform_2(%arg0: i32, %arg1: i32) -> (i32, i32) {
    %c0_i32 = arith.constant 0 : i32
    %c0_i32_0 = arith.constant 0 : i32
    return %arg0, %c0_i32 : i32, i32
  }
  func.func @transform_3(%arg0: i32, %arg1: i32) -> (i32, i32) {
    %c0_i32 = arith.constant 0 : i32
    return %arg0, %arg1 : i32, i32
  }
}

</mosaic_0001>

<bundles_post_ra>
// kernel: tpu_custom_call.1
= control target key start
LH: loop header
LB: loop body
LE: loop exit
PB: predicated region body
PF: predicated region fallthrough
CT: control target
= control target key end

     0   :  { %s115_s0 = inlined_call_operand.vmem [shape: f32[6,8], index: 0, kind: input, shape index: {}]   ;;  %s116_s1 = inlined_call_operand.vmem [shape: f32[6,1], index: 1, kind: input, shape index: {}]   ;;  %s117_s2 = inlined_call_operand.vmem [shape: f32[6,1], index: 2, kind: input, shape index: {}]   ;;  %s118_s3 = inlined_call_operand.hbm [shape: f32[6,8], index: 3, kind: output, shape index: {}]  }
   0x1   :  { %v16_v0 = vld [vmem:[%s116_s1] sm:$0xff] }
   0x2   :  { %8 = vsyncpa [#allocation3], 0  ;;  %v72_v1 = vmov 0   ;;  %v23_v2 = vld [vmem:[%s117_s2] sm:$0xff]  ;;  %s73_s18 = smov [#allocation2]  }
   0x3   :  { %47 = vset.pattern.permute.xlu0 %v72_v1  ;;  %v15_v4 = vld [vmem:[%s115_s0] sm:$0xff]  ;;  %s37_s19 = sshll.u32 %s73_s18, 4  ;;  %s38_s19 = int_to_ptr.vmem [resolvable:$true] %s37_s19 }
   0x4   :  { %19 = vperm.xlu0 %47, %v16_v0   ;;  %s48_s1 = scalar_lea.vmem %s38_s19, 128  ;;  %p53_p1 = scmp.lt.s32.totalorder %s38_s19, %s38_s19 }
   0x5   :  { %p49_p0 = scmp.ne.s32.totalorder %s38_s19, %s48_s1  ;;  %p54_p2 = scmp.lt.s32.totalorder %s48_s1, %s48_s1 }
   0x7   :  { %p55_p3 = por %p54_p2, %p53_p1 }
   0x8   :  { %26 = vperm.xlu0 %47, %v23_v2  }
   0x9   :  { %p56_p4 = pnand %p55_p3, %p49_p0 }
  0x83   :  { %v20_v3 = vpop.permute.xlu0 %19 }
  0x84   :  { %v22_v5 = vmul.f32 %v20_v3, %v15_v4 }
  0x87   :  { %v27_v6 = vpop.permute.xlu0 %26 }
  0x88   :  { %v29_v7 = vadd.f32 %v27_v6, %v22_v5 }
  0x8a   :  { %30 = vst [vmem:[#allocation2] sm:$0xff] %v29_v7 }
  0x8b   :  { %59 = shalt.err (!%p56_p4)
}
  0x8c   :  { %s60_s21 = scalar_lea.hbm %s118_s3, 128 }
  0x8d   :  { %p61_p5 = scmp.ne.s32.totalorder %s118_s3, %s60_s21  ;;  %p64_p6 = scmp.lt.u32.totalorder %s60_s21, %s118_s3 }
  0x8f   :  { %p66_p7 = pnand %p64_p6, %p61_p5 }
  0x91   :  { %69 = shalt.err (!%p66_p7)
}
  0x92   :  { %40 = dma.vmem_to_hbm [thread:$0]  %s38_s19, 128, %s118_s3, [#allocation3]  }
  0x93   :  { %70 = dma.done.wait [#allocation3], 128  }
  0x94   :  { %71 = vsyncadd [#allocation3], 4294967168 }
  0x95   :  { %44 = vsyncpa [#allocation3], 1 }

</bundles_post_ra>
